<compile_context>
chip_gen: v6e
topology: v6e:2x2x1
jax: 0.10.0
libtpu: 0.0.40
codegen_flags: <defaults>
</compile_context>

<pallas_src>
import jax
import jax.numpy as jnp
from jax.experimental import pallas as pl
from jax.experimental.pallas import tpu as pltpu


def _round_up(n: int, m: int) -> int:
    return ((n + m - 1) // m) * m


def _wn_skip_block_kernel(x_ref, xin_ref, wlnT_ref, bln_ref, wskpT_ref, o_ref):
    # Main branch on the MXU: [tm, in_f] @ [in_f, out_f], fp32 accumulation.
    # Weights arrive pre-transposed -> no per-step in-kernel transpose.
    acc = jnp.dot(x_ref[...], wlnT_ref[...], preferred_element_type=jnp.float32)

    # Skip branch on the VPU: in_skip is tiny (2), so unrolled broadcast FMAs
    # are cheaper than pushing a K=2 matmul through the MXU pipeline.
    # TODO(synk): if the caller can supply x pre-concatenated with x_input
    # ([N, 132]), fold this into the single MXU matmul (K pads to 256 anyway)
    # and drop the x_input stream entirely.
    xin = xin_ref[...]
    wskp_t = wskpT_ref[...]
    for k in range(xin.shape[1]):  # static trip count, unrolled at trace time
        acc = acc + xin[:, k:k + 1] * wskp_t[k:k + 1, :]

    # Bias (broadcast [1, out_f] over the batch tile) + ReLU, single store.
    acc = acc + bln_ref[...]
    o_ref[...] = jnp.maximum(acc, 0.0).astype(o_ref.dtype)


def wn_skip_block_forward(x, x_input, v_ln, g_ln, b_ln, v_skp, g_skp, *, tm=4096):
    """Pallas implementation of WNSkipBlock.forward.

    x:       [N, in_features]
    x_input: [N, in_skip_features]
    v_ln:    [out_features, in_features]          (weight_norm direction)
    g_ln:    [out_features, 1] or [out_features]  (weight_norm magnitude)
    b_ln:    [out_features]
    v_skp:   [out_features, in_skip_features]
    g_skp:   [out_features, 1] or [out_features]
    returns: [N, out_features]
    """
    N, in_f = x.shape
    _, in_skip = x_input.shape
    out_f = v_ln.shape[0]

    # --- WNLinear effective weights (computed once, outside the hot loop) ---
    w_ln = (g_ln.reshape(out_f, 1) * v_ln
            / jnp.linalg.norm(v_ln, axis=1, keepdims=True))          # [out_f, in_f]
    w_skp = (g_skp.reshape(out_f, 1) * v_skp
             / jnp.linalg.norm(v_skp, axis=1, keepdims=True))        # [out_f, in_skip]

    # Pre-transpose once so the kernel consumes them directly.
    w_ln_t = w_ln.T                                                   # [in_f, out_f]
    w_skp_t = w_skp.T                                                 # [in_skip, out_f]
    b_ln2 = b_ln.reshape(1, out_f)

    # --- Batch tiling: big tiles (mem-bound kernel), ragged cdiv grid -------
    # Cap the tile at ceil(N/2) (sublane-rounded) so there are >=2 tiles and
    # the "parallel" grid axis can be sharded across v7x's two TensorCores.
    tm_eff = min(tm, _round_up(pl.cdiv(N, 2), 8))
    tm_eff = max(_round_up(tm_eff, 8), 8)
    grid = (pl.cdiv(N, tm_eff),)

    # VMEM budget tracks the tile: lane-padded rows, double-buffered streams,
    # plus resident weights/bias.  Clamp to [32 MiB, 48 MiB] (48 < v7x's 64).
    lane = lambda d: _round_up(d, 128)
    row_bytes = 4 * (lane(in_f) + lane(in_skip) + lane(out_f))
    vmem_needed = 2 * tm_eff * row_bytes + 4 * (lane(in_f) + lane(in_skip) + 8) * lane(out_f)
    vmem_limit = int(min(48 * 1024 * 1024,
                         max(32 * 1024 * 1024, (vmem_needed * 5) // 4)))

    cost = pl.CostEstimate(
        flops=2 * N * out_f * (in_f + in_skip),
        transcendentals=0,
        bytes_accessed=4 * (N * (in_f + in_skip + out_f)
                            + in_f * out_f + in_skip * out_f + out_f),
    )

    out = pl.pallas_call(
        _wn_skip_block_kernel,
        out_shape=jax.ShapeDtypeStruct((N, out_f), x.dtype),
        grid_spec=pltpu.PrefetchScalarGridSpec(
            num_scalar_prefetch=0,
            grid=grid,
            in_specs=[
                pl.BlockSpec((tm_eff, in_f), lambda i: (i, 0)),       # x tile
                pl.BlockSpec((tm_eff, in_skip), lambda i: (i, 0)),    # x_input tile
                pl.BlockSpec((in_f, out_f), lambda i: (0, 0)),        # W_ln.T (resident)
                pl.BlockSpec((1, out_f), lambda i: (0, 0)),           # b_ln   (resident)
                pl.BlockSpec((in_skip, out_f), lambda i: (0, 0)),     # W_skp.T (resident)
            ],
            out_specs=pl.BlockSpec((tm_eff, out_f), lambda i: (i, 0)),
        ),
        compiler_params=pltpu.CompilerParams(
            dimension_semantics=("parallel",),    # batch tiles split across TCs
            vmem_limit_bytes=vmem_limit,
        ),
        cost_estimate=cost,
    )(x, x_input, w_ln_t, b_ln2, w_skp_t)

    return out


if __name__ == "__main__":
    # Module defaults: in_features=130, out_features=130, in_skip_features=2.
    in_features = 130
    out_features = 130
    in_skip_features = 2

    key = jax.random.PRNGKey(0)
    kx, kxin, kvln, kgln, kbln, kvskp, kgskp = jax.random.split(key, 7)

    # Deterministic synthetic weight_norm parameters (nn.Linear shapes).
    v_ln = jax.random.normal(kvln, (out_features, in_features), jnp.float32)
    g_ln = jax.random.uniform(kgln, (out_features, 1), jnp.float32, 0.5, 1.5)
    b_ln = jax.random.normal(kbln, (out_features,), jnp.float32) * 0.05
    v_skp = jax.random.normal(kvskp, (out_features, in_skip_features), jnp.float32)
    g_skp = jax.random.uniform(kgskp, (out_features, 1), jnp.float32, 0.5, 1.5)

    def reference(x, x_input):
        w_ln = g_ln * v_ln / jnp.linalg.norm(v_ln, axis=1, keepdims=True)
        w_skp = g_skp * v_skp / jnp.linalg.norm(v_skp, axis=1, keepdims=True)
        return jnp.maximum(x @ w_ln.T + b_ln[None, :] + x_input @ w_skp.T, 0.0)

    # batch=16 (aligned) and batch=13 (exercises the ragged last-block path).
    for batch in (16, 13):
        kx_b, kxin_b = jax.random.split(jax.random.fold_in(kx, batch))
        x = jax.random.normal(kx_b, (batch, in_features), dtype=jnp.float32)
        x_input = jax.random.normal(
            kxin_b, (batch, in_skip_features), dtype=jnp.float32)

        out = wn_skip_block_forward(x, x_input, v_ln, g_ln, b_ln, v_skp, g_skp)
        out = jax.block_until_ready(out)

        ref = reference(x, x_input)
        assert out.shape == (batch, out_features)
        assert jnp.allclose(out, ref, atol=1e-4, rtol=1e-4), "mismatch vs reference"

    print("KERNEL_OK")
</pallas_src>

<mosaic_0001>
module attributes {stable_mosaic.version = 11 : i64} {
  func.func @_wn_skip_block_kernel(%arg0: i32, %arg1: memref<8x130xf32, #tpu.memory_space<vmem>>, %arg2: memref<8x2xf32, #tpu.memory_space<vmem>>, %arg3: memref<130x130xf32, #tpu.memory_space<vmem>>, %arg4: memref<1x130xf32, #tpu.memory_space<vmem>>, %arg5: memref<2x130xf32, #tpu.memory_space<vmem>>, %arg6: memref<8x130xf32, #tpu.memory_space<vmem>>) attributes {dimension_semantics = [#tpu.dimension_semantics<parallel>], iteration_bounds = array<i64: 2>, scalar_prefetch = 0 : i64, scratch_operands = 0 : i64, tpu.core_type = #tpu.core_type<tc>, window_params = [{transform_indices = @transform_0, window_bounds = array<i64: 8, 130>}, {transform_indices = @transform_1, window_bounds = array<i64: 8, 2>}, {pipeline_mode = #tpu.pipeline_mode<synchronous>, transform_indices = @transform_2, window_bounds = array<i64: 130, 130>}, {pipeline_mode = #tpu.pipeline_mode<synchronous>, transform_indices = @transform_3, window_bounds = array<i64: 1, 130>}, {pipeline_mode = #tpu.pipeline_mode<synchronous>, transform_indices = @transform_4, window_bounds = array<i64: 2, 130>}, {transform_indices = @transform_5, window_bounds = array<i64: 8, 130>}]} {
    %c0 = arith.constant 0 : index
    %c0_0 = arith.constant 0 : index
    %0 = vector.load %arg1[%c0, %c0_0] : memref<8x130xf32, #tpu.memory_space<vmem>>, vector<8x130xf32>
    %c0_1 = arith.constant 0 : index
    %c0_2 = arith.constant 0 : index
    %1 = vector.load %arg3[%c0_1, %c0_2] : memref<130x130xf32, #tpu.memory_space<vmem>>, vector<130x130xf32>
    %cst = arith.constant dense<0.000000e+00> : vector<8x130xf32>
    %2 = tpu.matmul %0, %1, %cst {dimension_numbers = #tpu.dot_dimension_numbers<[1], [0], [0], [1], [0, 0, 1, 1], [], []>} : vector<8x130xf32>, vector<130x130xf32>, vector<8x130xf32> -> vector<8x130xf32>
    %c0_3 = arith.constant 0 : index
    %c0_4 = arith.constant 0 : index
    %3 = vector.load %arg2[%c0_3, %c0_4] : memref<8x2xf32, #tpu.memory_space<vmem>>, vector<8x2xf32>
    %c0_5 = arith.constant 0 : index
    %c0_6 = arith.constant 0 : index
    %4 = vector.load %arg5[%c0_5, %c0_6] : memref<2x130xf32, #tpu.memory_space<vmem>>, vector<2x130xf32>
    %5 = vector.extract_strided_slice %3 {offsets = [0, 0], sizes = [8, 1], strides = [1, 1]} : vector<8x2xf32> to vector<8x1xf32>
    %6 = vector.extract_strided_slice %4 {offsets = [0, 0], sizes = [1, 130], strides = [1, 1]} : vector<2x130xf32> to vector<1x130xf32>
    %7 = vector.broadcast %5 : vector<8x1xf32> to vector<8x130xf32>
    %8 = vector.broadcast %6 : vector<1x130xf32> to vector<8x130xf32>
    %9 = arith.mulf %7, %8 : vector<8x130xf32>
    %10 = arith.addf %2, %9 : vector<8x130xf32>
    %11 = vector.extract_strided_slice %3 {offsets = [0, 1], sizes = [8, 1], strides = [1, 1]} : vector<8x2xf32> to vector<8x1xf32>
    %12 = vector.extract_strided_slice %4 {offsets = [1, 0], sizes = [1, 130], strides = [1, 1]} : vector<2x130xf32> to vector<1x130xf32>
    %13 = vector.broadcast %11 : vector<8x1xf32> to vector<8x130xf32>
    %14 = vector.broadcast %12 : vector<1x130xf32> to vector<8x130xf32>
    %15 = arith.mulf %13, %14 : vector<8x130xf32>
    %16 = arith.addf %10, %15 : vector<8x130xf32>
    %c0_7 = arith.constant 0 : index
    %c0_8 = arith.constant 0 : index
    %17 = vector.load %arg4[%c0_7, %c0_8] : memref<1x130xf32, #tpu.memory_space<vmem>>, vector<1x130xf32>
    %18 = vector.broadcast %17 : vector<1x130xf32> to vector<8x130xf32>
    %19 = arith.addf %16, %18 : vector<8x130xf32>
    %cst_9 = arith.constant 0.000000e+00 : f32
    %20 = vector.broadcast %cst_9 : f32 to vector<8x130xf32>
    %21 = arith.maximumf %19, %20 : vector<8x130xf32>
    %c0_10 = arith.constant 0 : index
    %c0_11 = arith.constant 0 : index
    %22 = vector.load %arg6[%c0_10, %c0_11] : memref<8x130xf32, #tpu.memory_space<vmem>>, vector<8x130xf32>
    tpu.vector_store %arg6[%c0_10, %c0_11], %21 {strides = array<i32>} : memref<8x130xf32, #tpu.memory_space<vmem>>, vector<8x130xf32>,
    return
  }
  func.func @transform_0(%arg0: i32) -> (i32, i32) {
    %c0_i32 = arith.constant 0 : i32
    %c0_i32_0 = arith.constant 0 : i32
    return %arg0, %c0_i32 : i32, i32
  }
  func.func @transform_1(%arg0: i32) -> (i32, i32) {
    %c0_i32 = arith.constant 0 : i32
    %c0_i32_0 = arith.constant 0 : i32
    return %arg0, %c0_i32 : i32, i32
  }
  func.func @transform_2(%arg0: i32) -> (i32, i32) {
    %c0_i32 = arith.constant 0 : i32
    %c0_i32_0 = arith.constant 0 : i32
    %c0_i32_1 = arith.constant 0 : i32
    return %c0_i32, %c0_i32_0 : i32, i32
  }
  func.func @transform_3(%arg0: i32) -> (i32, i32) {
    %c0_i32 = arith.constant 0 : i32
    %c0_i32_0 = arith.constant 0 : i32
    %c0_i32_1 = arith.constant 0 : i32
    return %c0_i32, %c0_i32_0 : i32, i32
  }
  func.func @transform_4(%arg0: i32) -> (i32, i32) {
    %c0_i32 = arith.constant 0 : i32
    %c0_i32_0 = arith.constant 0 : i32
    %c0_i32_1 = arith.constant 0 : i32
    return %c0_i32, %c0_i32_0 : i32, i32
  }
  func.func @transform_5(%arg0: i32) -> (i32, i32) {
    %c0_i32 = arith.constant 0 : i32
    %c0_i32_0 = arith.constant 0 : i32
    return %arg0, %c0_i32 : i32, i32
  }
}

</mosaic_0001>

<bundles_post_ra>
// kernel: tpu_custom_call.1
= control target key start
LH: loop header
LB: loop body
LE: loop exit
PB: predicated region body
PF: predicated region fallthrough
CT: control target
= control target key end

     0   :  { %10 = vsyncpa [#allocation3], 0  ;;  %s991_s0 = inlined_call_operand.hbm [shape: f32[16,130], index: 0, kind: input, shape index: {}]   ;;  %s992_s1 = inlined_call_operand.vmem [shape: f32[16,2], index: 1, kind: input, shape index: {}]   ;;  %s993_s2 = inlined_call_operand.hbm [shape: f32[130,130], index: 2, kind: input, shape index: {}]   ;;  %s994_s3 = inlined_call_operand.vmem [shape: f32[1,130], index: 3, kind: input, shape index: {}]   ;;  %s995_s4 = inlined_call_operand.vmem [shape: f32[2,130], index: 4, kind: input, shape index: {}]   ;;  %s996_s5 = inlined_call_operand.hbm [shape: f32[16,130], index: 5, kind: output, shape index: {}]  }
   0x1   :  { %12 = vsyncpa [#allocation3 + $0x1], 0 }
   0x2   :  { %13 = vsyncpa [#allocation6], 0 }
   0x3   :  { %14 = vsyncpa [#allocation4], 0 }
   0x4   :  { %16 = vsyncpa [#allocation4 + $0x1], 0  ;;  %s816_s18 = smov 0   ;;  %s818_s19 = smov 0  }
   0x5   :  { %s820_s20 = smov 0   ;;  %s822_s21 = smov 0  }
   0x6 LB: > { %s837_s22 = sadd.s32 4294967295, %s777_s21   ;;  %s570_s23 = sadd.s32 4294967294, %s777_s21   ;;  %s777_s21 = sphi %s822_s21, %s1018_s21   ;;  %s773_s20 = sphi %s820_s20, %s1017_s20   ;;  %s769_s19 = sphi %s818_s19, %s1016_s19   ;;  %s765_s18 = sphi %s816_s18, %s1015_s18  }
   0x7   : > { %p42_p0 = scmp.ne.s32.totalorder %s769_s19, %s765_s18  ;;  %p997_p1 = scmp.eq.s32.totalorder %s837_s22, 0 }
   0x8   : > { %p161_p3 = scmp.eq.s32.totalorder %s570_s23, 1  ;;  %p571_p5 = scmp.ge.s32.totalorder %s777_s21, 1 }
   0x9   : > { %p846_p4 = por %p997_p1, %p42_p0  ;;  %p168_p7 = scmp.lt.s32.totalorder %s777_s21, 3 }
   0xa   : > { %p851_p6 = por %p161_p3, %p42_p0  ;;  %s779_s27 = smov [#allocation5]  }
   0xb   : > { %s1001_s24 = scalar_select %p846_p4, 1, 0 }
   0xc   : > { %s1002_s25 = scalar_select %p851_p6, 1, 0 }
   0xd   : > { %p856_p8 = pnand %p571_p5, %p168_p7  ;;  %s180_s28 = sshll.u32 %s779_s27, 4  ;;  %s181_s28 = int_to_ptr.vmem [resolvable:$true] %s180_s28 }
   0xe   : > { %s870_s30 = sadd.s32 1, %s777_s21   ;;  %s29_s6 = sadd.s32 1, %s773_s20 }
   0xf   : > { %s1003_s26 = scalar_select %p856_p8, 1, 0 }
  0x10   : > { %p600_p9 = pneg %p856_p8  ;;  %s26_s7 = ssub.s32 %s777_s21, %s870_s30 }
  0x11   : > { %s666_s8 = scalar_lea.vmem %s181_s28, 4352  ;;  %p674_p5 = scmp.lt.s32.totalorder %s181_s28, %s181_s28 }
  0x12   : > { %p865_p11 = pnand %p600_p9, %p997_p1  ;;  %p667_p13 = scmp.ne.s32.totalorder %s181_s28, %s666_s8 }
  0x13   : > { %p675_p7 = scmp.lt.s32.totalorder %s666_s8, %s666_s8 }
  0x14   : > { %p657_p12 = pneg %p865_p11 }
  0x15   : > { %p676_p10 = por %p675_p7, %p674_p5 }
  0x16   : > { %p669_p0 = pnand %p667_p13, %p657_p12 }
  0x18   : > { %p670_p3 = pneg %p669_p0 }
  0x1a   : > { %p677_p2 = pnand %p676_p10, %p670_p3 }
  0x1c   : > { %680 = shalt.err (!%p677_p2)
}
  0x1d   : > { %s780_s9 = smov 256   ;;  %s781_s10 = smov 16  }
  0x1e   : > { %603 = dma.hbm_to_vmem [thread:$0]  (!%p865_p11), %s993_s2, 4352, %s181_s28, [#allocation6], %s780_s9, %s780_s9, %s781_s10  }
  0x1f   : > { %p27_p9 = scmp.eq.s32.totalorder %s26_s7, 0  ;;  %p36_p12 = scmp.ne.s32.totalorder %s773_s20, %s769_s19 }
  0x20   : > { %p37_p10 = scmp.eq.s32.totalorder %s777_s21, 0  ;;  %p613_p2 = scmp.lt.s32.totalorder %s777_s21, 2 }
  0x21   : > { %s887_s13 = scalar_select %p27_p9, %s773_s20, %s29_s6  }
  0x22   : > { %p38_p13 = por %p37_p10, %p36_p12  ;;  %p1005_p0 = scmp.eq.s32.totalorder %s837_s22, 1 }
  0x23   : > { %s200_s15 = sand.u32 1, %s773_s20   ;;  %s590_s16 = sshll.u32 %s777_s21, 8 }
  0x24   : > { %p891_p3 = por %p1005_p0, %p36_p12  ;;  %s574_s17 = sshll.u32 %s200_s15, 4 }
  0x25   : > { %s900_s29 = scalar_lea.hbm %s991_s0, %s590_s16  ;;  %s204_s28 = scalar_lea.vmem [#allocation2], %s574_s17 }
  0x26   : > { %s1006_s14 = scalar_select %p891_p3, 1, 0 }
  0x27   : > { %s212_s6 = sshll.u32 %s204_s28, 4  ;;  %p902_p11 = pnand %p613_p2, %p38_p13  ;;  %s213_s6 = int_to_ptr.vmem [resolvable:$true] %s212_s6 }
  0x28   : > { %s201_s8 = scalar_lea.sflag [#allocation3], %s200_s15  ;;  %s681_s9 = scalar_lea.hbm %s900_s29, 256 }
  0x29   : > { %p682_p5 = scmp.ne.s32.totalorder %s900_s29, %s681_s9  ;;  %p683_p7 = pneg %p902_p11 }
  0x2a   : > { %s686_s12 = scalar_lea.hbm %s991_s0, 512  ;;  %p687_p10 = scmp.lt.s32.totalorder %s900_s29, %s991_s0 }
  0x2b   : > { %p684_p9 = pnand %p683_p7, %p682_p5  ;;  %p688_p2 = scmp.lt.s32.totalorder %s686_s12, %s681_s9 }
  0x2d   : > { %p685_p12 = pneg %p684_p9  ;;  %p689_p13 = por %p688_p2, %p687_p10 }
  0x2f   : > { %p690_p0 = pnand %p689_p13, %p685_p12 }
  0x31   : > { %693 = shalt.err (!%p690_p0)
}
  0x32   : > { %s694_s23 = scalar_lea.vmem %s213_s6, 256  ;;  %s782_s15 = smov [#allocation2]  }
  0x33   : > { %p695_p1 = scmp.ne.s32.totalorder %s213_s6, %s694_s23  ;;  %s699_s27 = sshll.u32 %s782_s15, 4  ;;  %s700_s27 = int_to_ptr.vmem [resolvable:$false] %s699_s27 }
  0x34   : > { %s701_s28 = scalar_lea.vmem %s700_s27, 512  ;;  %p702_p5 = scmp.lt.s32.totalorder %s213_s6, %s700_s27 }
  0x35   : > { %p697_p6 = pnand %p695_p1, %p683_p7  ;;  %p703_p9 = scmp.lt.s32.totalorder %s701_s28, %s694_s23 }
  0x37   : > { %p698_p3 = pneg %p697_p6  ;;  %p704_p4 = por %p703_p9, %p702_p5 }
  0x39   : > { %p705_p8 = pnand %p704_p4, %p698_p3 }
  0x3b   : > { %708 = shalt.err (!%p705_p8)
}
  0x3c   : > { %607 = dma.hbm_to_vmem [thread:$0]  (!%p902_p11), %s900_s29, 256, %s213_s6, %s201_s8  }
  0x3d   : > { %p1008_p12 = scmp.ne.s32.totalorder %s1003_s26, 0 }
  0x3e   : > { %s923_s9 = sand.u32 (!%p1008_p12), 1, %s769_s19   ;;  %p1009_p1 = scmp.ne.s32.totalorder (!%p1008_p12), %s1001_s24, 0 }
  0x3f   : > { %228 = sbr.rel (%p1008_p12) target bundleno = 323 (0x143), region = 40  ;;  %s578_s10 = sshll.u32 (!%p1008_p12), %s923_s9, 4 }
  0x40   : > { %s231_s11 = scalar_lea.sflag (!%p1008_p12), [#allocation3], %s923_s9  ;;  %s929_s12 = scalar_lea.vmem (!%p1008_p12), [#allocation2], %s578_s10 }
  0x44   : > { %752 = dma.done.wait (%p1009_p1), %s231_s11, 256  }
  0x45   : > { %754 = vsyncadd (%p1009_p1), %s231_s11, 4294967040  ;;  %p1010_p4 = scmp.eq.s32.totalorder %s837_s22, 0 }
  0x47   : > { %756 = dma.done.wait (%p1010_p4), [#allocation6], 4352   ;;  %p1011_p6 = pmov %p1010_p4 }
  0x48   : > { %v783_v0 = vmov 0   ;;  %p269_p8 = scmp.lt.s32.totalorder %s837_s22, 1  ;;  %v306_v1 = vld [vmem:[#allocation5 + $0xf8] sm:$0xff]  ;;  %v305_v2 = vld [vmem:[#allocation5 + $0xf0] sm:$0xff]  ;;  %v304_v3 = vld [vmem:[#allocation5 + $0xe8] sm:$0xff]  ;;  %vm337_vm0 = vcmask 15360   ;;  %v317_v39 = vlaneseq }
  0x49   : > { %758 = vsyncadd (%p1011_p6), [#allocation6], 4294962944  ;;  %653 = vset.pattern.permute.xlu0 %v783_v0  ;;  %348 = vmatprep.subr.mxu0 %v306_v1  ;;  %v303_v4 = vld [vmem:[#allocation5 + $0xe0] sm:$0xff]  ;;  %v302_v5 = vld [vmem:[#allocation5 + $0xd8] sm:$0xff]  ;;  %v784_v23 = vmov 1   ;;  %vm341_vm1 = vcmask 1041408  }
  0x4a   : > { %349 = vmatpush1.msra.mxu0 %v305_v2  ;;  %s270_s24 = scalar_select %p269_p8, %s837_s22, 1  ;;  %v301_v6 = vld [vmem:[#allocation5 + $0xd0] sm:$0xff]  ;;  %v300_v7 = vld [vmem:[#allocation5 + $0xc8] sm:$0xff]  ;;  %v299_v8 = vld [vmem:[#allocation5 + $0xc0] sm:$0xff]  ;;  %v318_v40 = vshrl.u32 %v317_v39, 7 }
  0x4b   : > { %350 = vmatprep.subr.mxu0 %v304_v3  ;;  %v298_v9 = vld [vmem:[#allocation5 + $0xb8] sm:$0xff]  ;;  %v297_v10 = vld [vmem:[#allocation5 + $0xb0] sm:$0xff]  ;;  %v296_v11 = vld [vmem:[#allocation5 + $0xa8] sm:$0xff]  ;;  %s591_s15 = sshll.u32 %s837_s22, 8  ;;  %s268_s27 = scalar_lea.vmem [#allocation7], %s578_s10 }
  0x4c   : > { %351 = vmatpush1.msra.mxu0 %v303_v4  ;;  %s581_s26 = sshll.u32 %s270_s24, 3  ;;  %v295_v12 = vld [vmem:[#allocation5 + $0xa0] sm:$0xff]  ;;  %v294_v13 = vld [vmem:[#allocation5 + $0x98] sm:$0xff]  ;;  %v293_v14 = vld [vmem:[#allocation5 + $0x90] sm:$0xff]  ;;  %v319_v41 = vsub.s32 0, %v318_v40  ;;  %v425_v43 = vsub.s32 1, %v318_v40  ;;  %s476_s24 = scalar_lea.hbm %s996_s5, %s591_s15 }
  0x4d   : > { %352 = vmatprep.subr.mxu0 %v302_v5  ;;  %s272_s7 = scalar_lea.vmem %s992_s1, %s581_s26  ;;  %v274_v15 = vld [vmem:[%s929_s12 + $0x8] sm:$0xff]  ;;  %v291_v18 = vld [vmem:[#allocation5 + $0x80] sm:$0xff]  ;;  %v289_v20 = vld [vmem:[#allocation5 + $0x70] sm:$0xff]  ;;  %v323_v45 = vsub.s32 2, %v318_v40  ;;  %v429_v46 = vsub.s32 3, %v318_v40  ;;  %s478_s28 = sshll.u32 %s268_s27, 4  ;;  %s479_s28 = int_to_ptr.vmem [resolvable:$true] %s478_s28 }
  0x4e   : > { %353 = vmatpush1.msra.mxu0 %v301_v6  ;;  %v292_v16 = vld [vmem:[#allocation5 + $0x88] sm:$0xff]  ;;  %584 = vmatprep.mubr.msk.f32.mxu0 %vm337_vm0, %v274_v15  ;;  %v309_v17 = vld [vmem:[%s272_s7] sm:$0xff]  ;;  %v290_v19 = vld [vmem:[#allocation5 + $0x78] sm:$0xff]  ;;  %s464_s26 = scalar_lea.sflag [#allocation4], %s923_s9  ;;  %s709_s29 = scalar_lea.vmem %s479_s28, 256 }
  0x4f   : > { %354 = vmatprep.subr.mxu0 %v300_v7  ;;  %313 = vperm.xlu0 %653, %v309_v17   ;;  %v288_v21 = vld [vmem:[#allocation5 + $0x68] sm:$0xff]  ;;  %v287_v22 = vld [vmem:[#allocation5 + $0x60] sm:$0xff]  ;;  %v286_v24 = vld [vmem:[#allocation5 + $0x58] sm:$0xff]  ;;  %p710_p3 = scmp.ne.s32.totalorder %s479_s28, %s709_s29  ;;  %p1012_p11 = scmp.ne.s32.totalorder %s1006_s14, 0 }
  0x50   : > { %355 = vmatpush1.msra.mxu0 %v299_v8  ;;  %v285_v25 = vld [vmem:[#allocation5 + $0x50] sm:$0xff]  ;;  %v284_v26 = vld [vmem:[#allocation5 + $0x48] sm:$0xff]  ;;  %v283_v27 = vld [vmem:[#allocation5 + $0x40] sm:$0xff]  ;;  %s785_s22 = smov [#allocation7]  }
  0x51   : > { %356 = vmatprep.subr.mxu0 %v298_v9  ;;  %v282_v28 = vld [vmem:[#allocation5 + $0x38] sm:$0xff]  ;;  %v281_v29 = vld [vmem:[#allocation5 + $0x30] sm:$0xff]  ;;  %v280_v30 = vld [vmem:[#allocation5 + $0x28] sm:$0xff]  ;;  %p711_p7 = pnand %p710_p3, %p1012_p11  ;;  %s713_s10 = sshll.u32 %s785_s22, 4  ;;  %s714_s10 = int_to_ptr.vmem [resolvable:$false] %s713_s10 }
  0x52   : > { %357 = vmatpush1.msra.mxu0 %v297_v10  ;;  %v279_v31 = vld [vmem:[#allocation5 + $0x20] sm:$0xff]  ;;  %v278_v32 = vld [vmem:[#allocation5 + $0x18] sm:$0xff]  ;;  %v277_v33 = vld [vmem:[#allocation5 + $0x10] sm:$0xff]  ;;  %s715_s6 = scalar_lea.vmem %s714_s10, 512  ;;  %p716_p2 = scmp.lt.s32.totalorder %s479_s28, %s714_s10 }
  0x53   : > { %358 = vmatprep.subr.mxu0 %v296_v11  ;;  %654 = vset.pattern.permute.xlu0 %v784_v23  ;;  %v276_v34 = vld [vmem:[#allocation5 + $0x8] sm:$0xff]  ;;  %v275_v35 = vld [vmem:[#allocation5] sm:$0xff]  ;;  %p712_p10 = pneg %p711_p7  ;;  %p717_p13 = scmp.lt.s32.totalorder %s715_s6, %s709_s29 }
  0x54   : > { %359 = vmatpush1.msra.mxu0 %v295_v12  ;;  %420 = vperm.xlu0 %654, %v309_v17   ;;  %v308_v36 = vld [vmem:[#allocation5 + $0x108] sm:$0x3]  ;;  %v307_v37 = vld [vmem:[#allocation5 + $0x100] sm:$0x3] }
  0x55   : > { %360 = vmatprep.subr.mxu0 %v294_v13  ;;  %v273_v38 = vld [vmem:[%s929_s12] sm:$0xff]  ;;  %p718_p0 = por %p717_p13, %p716_p2 }
  0x56   : > { %361 = vmatpush1.msra.mxu0 %v293_v14  ;;  %v310_v42 = vld [vmem:[%s995_s4] sm:$0xf] }
  0x57   : > { %362 = vmatprep.subr.mxu0 %v292_v16  ;;  %v320_v44 = vrot.slane %v310_v42, %v319_v41  ;;  %v426_v48 = vrot.slane %v310_v42, %v425_v43  ;;  %v324_v49 = vrot.slane %v310_v42, %v323_v45  ;;  %v430_v51 = vrot.slane %v310_v42, %v429_v46  ;;  %v445_v57 = vld [vmem:[%s994_s3] sm:$0x3]  ;;  %p719_p5 = pnand %p718_p0, %p712_p10 }
  0x58   : > { %363 = vmatpush1.msra.mxu0 %v291_v18  ;;  %v450_v63 = vrot.slane %v445_v57, %v319_v41  ;;  %v454_v3 = vrot.slane %v445_v57, %v425_v43 }
  0x59   : > { %364 = vmatprep.subr.mxu0 %v290_v19  ;;  %v330_v50 = vrot.slane %v320_v44, %v319_v41  ;;  %v436_v52 = vrot.slane %v426_v48, %v425_v43  ;;  %v334_v54 = vrot.slane %v324_v49, %v319_v41  ;;  %v440_v56 = vrot.slane %v430_v51, %v425_v43 }
  0x5a   : > { %365 = vmatpush1.msra.mxu0 %v289_v20 }
  0x5b   : > { %366 = vmatprep.subr.mxu0 %v288_v21 }
  0x5c   : > { %367 = vmatpush1.msra.mxu0 %v287_v22 }
  0x5d   : > { %368 = vmatprep.subr.mxu0 %v286_v24 }
  0x5e   : > { %369 = vmatpush1.msra.mxu0 %v285_v25 }
  0x5f   : > { %370 = vmatprep.subr.mxu0 %v284_v26 }
  0x60   : > { %371 = vmatpush1.msra.mxu0 %v283_v27 }
  0x61   : > { %372 = vmatprep.subr.mxu0 %v282_v28 }
  0x62   : > { %373 = vmatpush1.msra.mxu0 %v281_v29 }
  0x63   : > { %374 = vmatprep.subr.mxu0 %v280_v30 }
  0x64   : > { %375 = vmatpush1.msra.mxu0 %v279_v31 }
  0x65   : > { %376 = vmatprep.subr.mxu0 %v278_v32 }
  0x66   : > { %377 = vmatpush1.msra.mxu0 %v277_v33 }
  0x67   : > { %378 = vmatprep.subr.mxu0 %v276_v34 }
  0x68   : > { %379 = vmatpush1.msra.mxu0 %v275_v35 }
  0x69   : > { %582 = vmatprep.subr.msk.mxu0 %vm341_vm1, %v308_v36 }
  0x6a   : > { %583 = vmatpush2.msk.msra.mxu0 %vm341_vm1, %v307_v37 }
  0x6b   : > { %413 = vmatmul.mubr.f32.vlgmr.msra.gmra.mxu0 %v273_v38 }
  0xca   : > { %v314_v47 = vpop.permute.xlu0 %313 }
  0xcb   : > { %v335_v55 = vmul.f32 %v330_v50, %v314_v47  ;;  %v336_v60 = vmul.f32 %v334_v54, %v314_v47 }
  0xcf   : > { %v421_v53 = vpop.permute.xlu0 %420 }
  0xd0   : > { %v441_v58 = vmul.f32 %v436_v52, %v421_v53  ;;  %v442_v61 = vmul.f32 %v440_v56, %v421_v53 }
 0x12b   : > { %v414_v59 = vpop.f32.mrf.mxu0 }
 0x12c   : > { %v415_v62 = vadd.f32 %v414_v59, %v335_v55 }
 0x12d   : > { %v416_v0 = vpop.f32.mrf.mxu0 }
 0x12e   : > { %v443_v1 = vadd.f32 %v441_v58, %v415_v62  ;;  %v417_v2 = vadd.f32 %v416_v0, %v336_v60 }
 0x130   : > { %v457_v4 = vadd.f32 %v450_v63, %v443_v1  ;;  %v444_v5 = vadd.f32 %v442_v61, %v417_v2 }
 0x132   : > { %v459_v6 = vmax.f32 %v457_v4, 0.0  ;;  %v458_v7 = vadd.f32 %v454_v3, %v444_v5 }
 0x134   : > { %v460_v8 = vmax.f32 %v458_v7, 0.0  ;;  %461 = vst [vmem:[%s268_s27] sm:$0xff] %v459_v6 }
 0x136   : > { %462 = vst.msk [vmem:[%s268_s27 + $0x8] sm:$0xff] %vm337_vm0, %v460_v8 }
 0x137   : > { %722 = shalt.err (!%p719_p5)
}
 0x138   : > { %s723_s7 = scalar_lea.hbm %s476_s24, 256  ;;  %s727_s16 = scalar_lea.hbm %s996_s5, 512 }
 0x139   : > { %p724_p9 = scmp.ne.s32.totalorder %s476_s24, %s723_s7  ;;  %p728_p4 = scmp.lt.s32.totalorder %s476_s24, %s996_s5 }
 0x13a   : > { %p729_p6 = scmp.lt.s32.totalorder %s727_s16, %s723_s7 }
 0x13b   : > { %p725_p12 = pnand %p724_p9, %p1012_p11 }
 0x13c   : > { %p730_p8 = por %p729_p6, %p728_p4 }
 0x13d   : > { %p726_p1 = pneg %p725_p12 }
 0x13f   : > { %p731_p3 = pnand %p730_p8, %p726_p1 }
 0x141   : > { %734 = shalt.err (!%p731_p3)
}
 0x142   : > { %598 = dma.vmem_to_hbm [thread:$0]  (%p1012_p11), %s479_s28, 256, %s476_s24, %s464_s26  }
 0x143 PF: > { %s490_s15 = sand.u32 1, %s765_s18   ;;  %p1013_p7 = scmp.ne.s32.totalorder %s1002_s25, 0 }
 0x144   : > { %p1014_p10 = scmp.ge.s32.totalorder %s777_s21, 2  ;;  %s491_s27 = scalar_lea.sflag [#allocation4], %s490_s15 }
 0x146   : > { %p609_p2 = pnand %p1014_p10, %p1013_p7 }
 0x148   : > { %p610_p13 = pneg %p609_p2 }
 0x14a   : > { %760 = dma.done.wait (%p610_p13), %s491_s27, 256  }
 0x14b   : > { %762 = vsyncadd (%p610_p13), %s491_s27, 4294967040  ;;  %p19_p0 = scmp.ge.s32.totalorder %s870_s30, 4   ;;  %s1015_s18 = smov %s769_s19 }
 0x14c   : > { %s1016_s19 = smov %s773_s20  ;;  %s1017_s20 = smov %s887_s13 }
 0x14d   : > { %s1018_s21 = smov %s870_s30  ;;  %21 = sbr.rel (!%p19_p0) target bundleno = 6 (0x6), region = 92 }
 0x152   :  { %496 = vsyncpa [#allocation3], 1 }
 0x153   :  { %498 = vsyncpa [#allocation3 + $0x1], 1 }
 0x154   :  { %499 = vsyncpa [#allocation6], 1 }
 0x155   :  { %500 = vsyncpa [#allocation4], 1 }
 0x156   :  { %502 = vsyncpa [#allocation4 + $0x1], 1 }

</bundles_post_ra>
